<compile_context>
chip_gen: v6e
topology: v6e:2x2x1
jax: 0.10.0
libtpu: 0.0.40
codegen_flags: <defaults>
</compile_context>

<pallas_src>
import functools

import jax
import jax.numpy as jnp
from jax.experimental import pallas as pl
from jax.experimental.pallas import tpu as pltpu


def _ce_label_smooth_kernel(x_ref, t_ref, out_ref, *, epsilon, num_classes, batch, tb):
    # x_ref:   (TB, C)  logits block in VMEM
    # t_ref:   (TB, 1)  int32 labels block in VMEM
    # out_ref: (TB, 1)  f32 per-row loss block
    i = pl.program_id(0)

    x = x_ref[...].astype(jnp.float32)                        # (TB, C)
    labels = t_ref[...]                                       # (TB, 1) int32

    # Mask rows past the true batch size (last tile may be padded).
    row = jax.lax.broadcasted_iota(jnp.int32, (tb, 1), 0)     # (TB, 1)
    valid = (row + i * tb) < batch                            # (TB, 1) bool

    # Numerically stable log-softmax pieces over the class (lane) axis.
    m = jnp.max(x, axis=-1, keepdims=True)                    # (TB, 1)
    shifted = x - m                                           # (TB, C)
    lse = jnp.log(jnp.sum(jnp.exp(shifted), axis=-1, keepdims=True))  # (TB, 1)

    # Gather shifted logit at the label without materializing a dense one-hot/target
    # tensor or log_probs (iota compare + masked row-sum).
    col = jax.lax.broadcasted_iota(jnp.int32, x.shape, 1)     # (TB, C)
    label_shifted = jnp.sum(
        jnp.where(col == labels, shifted, 0.0), axis=-1, keepdims=True)  # (TB, 1)
    sum_shifted = jnp.sum(shifted, axis=-1, keepdims=True)    # (TB, 1)

    # loss_b = -(1-eps)*log_p[b, y_b] - (eps/C) * sum_c log_p[b, c]
    loss_rows = (-(1.0 - epsilon) * (label_shifted - lse)
                 - (epsilon / num_classes) * (sum_shifted - num_classes * lse))
    out_ref[...] = jnp.where(valid, loss_rows, 0.0)


def cross_entropy_label_smooth(inputs, targets, *, num_classes, epsilon=0.1,
                               block_batch=None, vmem_budget_bytes=8 * 1024 * 1024):
    """inputs: (B, C) float logits (f32 or bf16); targets: (B,) int labels.
    Returns scalar f32 loss identical to the PyTorch CrossEntropyLabelSmooth forward."""
    B, C = inputs.shape
    assert C == num_classes
    targets_2d = targets.astype(jnp.int32).reshape(B, 1)

    # Pick a batch tile so a double-buffered f32 logits block stays within budget
    # (budget chosen so the kernel also fits v7x's smaller 64 MiB VMEM).
    if block_batch is None:
        tb = max(1, vmem_budget_bytes // (2 * C * 4))
    else:
        tb = int(block_batch)
    if tb >= B:
        tb = B                          # single tile covering the full batch dim
    else:
        tb = max(8, (tb // 8) * 8)      # sublane-aligned batch tiles
    num_tiles = pl.cdiv(B, tb)

    # TODO(synk): for vocab-sized C, add a class grid axis with an online max/logsumexp
    # carried in scratch instead of requiring the full class dim in one block.

    kernel = functools.partial(
        _ce_label_smooth_kernel,
        epsilon=float(epsilon),
        num_classes=float(num_classes),
        batch=int(B),
        tb=int(tb),
    )

    per_row = pl.pallas_call(
        kernel,
        out_shape=jax.ShapeDtypeStruct((num_tiles * tb, 1), jnp.float32),
        grid=(num_tiles,),
        in_specs=[
            pl.BlockSpec((tb, C), lambda i: (i, 0)),   # logits tile, lane-dense full C
            pl.BlockSpec((tb, 1), lambda i: (i, 0)),   # labels tile
        ],
        out_specs=pl.BlockSpec((tb, 1), lambda i: (i, 0)),  # per-row losses
        compiler_params=pltpu.CompilerParams(
            dimension_semantics=("parallel",),          # independent tiles -> megacore OK
            vmem_limit_bytes=32 * 1024 * 1024,
        ),
    )(inputs, targets_2d)

    # Tiny final reduction in plain JAX: mean(0).sum() == sum / B (padded rows are 0).
    return jnp.sum(per_row) / B


def _reference(inputs, targets, *, num_classes, epsilon=0.1):
    log_probs = jax.nn.log_softmax(inputs.astype(jnp.float32), axis=1)
    onehot = jax.nn.one_hot(targets, num_classes, dtype=jnp.float32)
    t = (1.0 - epsilon) * onehot + epsilon / num_classes
    return jnp.sum(jnp.mean(-t * log_probs, axis=0))


if __name__ == "__main__":
    key = jax.random.PRNGKey(0)
    k1, k2, k3, k4 = jax.random.split(key, 4)

    # Small case matching the module's expected shapes: (batch, num_classes) logits.
    B, C = 8, 32
    inputs = jax.random.normal(k1, (B, C), dtype=jnp.float32)
    targets = jax.random.randint(k2, (B,), 0, C, dtype=jnp.int32)

    loss = cross_entropy_label_smooth(inputs, targets, num_classes=C, epsilon=0.1)
    loss = jax.block_until_ready(loss)
    ref = _reference(inputs, targets, num_classes=C, epsilon=0.1)
    assert jnp.allclose(loss, ref, atol=1e-5, rtol=1e-5), (loss, ref)

    # Exercise the multi-tile path with a masked (non-divisible) tail and lane-dense C.
    B2, C2 = 20, 256
    inputs2 = jax.random.normal(k3, (B2, C2), dtype=jnp.float32)
    targets2 = jax.random.randint(k4, (B2,), 0, C2, dtype=jnp.int32)
    loss2 = cross_entropy_label_smooth(inputs2, targets2, num_classes=C2,
                                       epsilon=0.1, block_batch=8)
    loss2 = jax.block_until_ready(loss2)
    ref2 = _reference(inputs2, targets2, num_classes=C2, epsilon=0.1)
    assert jnp.allclose(loss2, ref2, atol=1e-5, rtol=1e-5), (loss2, ref2)

    print("KERNEL_OK")
</pallas_src>

<mosaic_0001>
module attributes {stable_mosaic.version = 11 : i64} {
  func.func @_ce_label_smooth_kernel(%arg0: i32, %arg1: memref<8x32xf32, #tpu.memory_space<vmem>>, %arg2: memref<8x1xi32, #tpu.memory_space<vmem>>, %arg3: memref<8x1xf32, #tpu.memory_space<vmem>>) attributes {dimension_semantics = [#tpu.dimension_semantics<parallel>], iteration_bounds = array<i64: 1>, scalar_prefetch = 0 : i64, scratch_operands = 0 : i64, tpu.core_type = #tpu.core_type<tc>, window_params = [{transform_indices = @transform_0, window_bounds = array<i64: 8, 32>}, {transform_indices = @transform_1, window_bounds = array<i64: 8, 1>}, {transform_indices = @transform_2, window_bounds = array<i64: 8, 1>}]} {
    %c0 = arith.constant 0 : index
    %c0_0 = arith.constant 0 : index
    %0 = vector.load %arg1[%c0, %c0_0] : memref<8x32xf32, #tpu.memory_space<vmem>>, vector<8x32xf32>
    %c0_1 = arith.constant 0 : index
    %c0_2 = arith.constant 0 : index
    %1 = vector.load %arg2[%c0_1, %c0_2] : memref<8x1xi32, #tpu.memory_space<vmem>>, vector<8x1xi32>
    %2 = tpu.iota {dimensions = array<i32: 0>} : vector<8x1xi32>
    %c8_i32 = arith.constant 8 : i32
    %3 = arith.muli %arg0, %c8_i32 : i32
    %4 = vector.broadcast %3 : i32 to vector<8x1xi32>
    %5 = arith.addi %2, %4 : vector<8x1xi32>
    %c8_i32_3 = arith.constant 8 : i32
    %6 = vector.broadcast %c8_i32_3 : i32 to vector<8x1xi32>
    %7 = arith.cmpi slt, %5, %6 : vector<8x1xi32>
    %cst = arith.constant dense<0xFF800000> : vector<8xf32>
    %8 = vector.multi_reduction <maximumf>, %0, %cst [1] : vector<8x32xf32> to vector<8xf32>
    %9 = vector.shape_cast %8 : vector<8xf32> to vector<8x1xf32>
    %10 = vector.broadcast %9 : vector<8x1xf32> to vector<8x32xf32>
    %11 = arith.subf %0, %10 : vector<8x32xf32>
    %12 = math.exp %11 : vector<8x32xf32>
    %cst_4 = arith.constant dense<0.000000e+00> : vector<8xf32>
    %13 = vector.multi_reduction <add>, %12, %cst_4 [1] : vector<8x32xf32> to vector<8xf32>
    %14 = vector.shape_cast %13 : vector<8xf32> to vector<8x1xf32>
    %15 = math.log %14 : vector<8x1xf32>
    %16 = tpu.iota {dimensions = array<i32: 1>} : vector<8x32xi32>
    %17 = vector.broadcast %1 : vector<8x1xi32> to vector<8x32xi32>
    %18 = arith.cmpi eq, %16, %17 : vector<8x32xi32>
    %cst_5 = arith.constant 0.000000e+00 : f32
    %19 = vector.broadcast %cst_5 : f32 to vector<8x32xf32>
    %20 = arith.select %18, %11, %19 : vector<8x32xi1>, vector<8x32xf32>
    %cst_6 = arith.constant dense<0.000000e+00> : vector<8xf32>
    %21 = vector.multi_reduction <add>, %20, %cst_6 [1] : vector<8x32xf32> to vector<8xf32>
    %22 = vector.shape_cast %21 : vector<8xf32> to vector<8x1xf32>
    %cst_7 = arith.constant dense<0.000000e+00> : vector<8xf32>
    %23 = vector.multi_reduction <add>, %11, %cst_7 [1] : vector<8x32xf32> to vector<8xf32>
    %24 = vector.shape_cast %23 : vector<8xf32> to vector<8x1xf32>
    %25 = arith.subf %22, %15 : vector<8x1xf32>
    %cst_8 = arith.constant -0.899999976 : f32
    %26 = vector.broadcast %cst_8 : f32 to vector<8x1xf32>
    %27 = arith.mulf %26, %25 : vector<8x1xf32>
    %cst_9 = arith.constant 3.200000e+01 : f32
    %28 = vector.broadcast %cst_9 : f32 to vector<8x1xf32>
    %29 = arith.mulf %28, %15 : vector<8x1xf32>
    %30 = arith.subf %24, %29 : vector<8x1xf32>
    %cst_10 = arith.constant 3.125000e-03 : f32
    %31 = vector.broadcast %cst_10 : f32 to vector<8x1xf32>
    %32 = arith.mulf %31, %30 : vector<8x1xf32>
    %33 = arith.subf %27, %32 : vector<8x1xf32>
    %cst_11 = arith.constant 0.000000e+00 : f32
    %34 = vector.broadcast %cst_11 : f32 to vector<8x1xf32>
    %35 = arith.select %7, %33, %34 : vector<8x1xi1>, vector<8x1xf32>
    %c0_12 = arith.constant 0 : index
    %c0_13 = arith.constant 0 : index
    %36 = vector.load %arg3[%c0_12, %c0_13] : memref<8x1xf32, #tpu.memory_space<vmem>>, vector<8x1xf32>
    tpu.vector_store %arg3[%c0_12, %c0_13], %35 {strides = array<i32>} : memref<8x1xf32, #tpu.memory_space<vmem>>, vector<8x1xf32>,
    return
  }
  func.func @transform_0(%arg0: i32) -> (i32, i32) {
    %c0_i32 = arith.constant 0 : i32
    %c0_i32_0 = arith.constant 0 : i32
    return %arg0, %c0_i32 : i32, i32
  }
  func.func @transform_1(%arg0: i32) -> (i32, i32) {
    %c0_i32 = arith.constant 0 : i32
    %c0_i32_0 = arith.constant 0 : i32
    return %arg0, %c0_i32 : i32, i32
  }
  func.func @transform_2(%arg0: i32) -> (i32, i32) {
    %c0_i32 = arith.constant 0 : i32
    %c0_i32_0 = arith.constant 0 : i32
    return %arg0, %c0_i32 : i32, i32
  }
}

</mosaic_0001>

<bundles_post_ra>
// kernel: tpu_custom_call.1
= control target key start
LH: loop header
LB: loop body
LE: loop exit
PB: predicated region body
PF: predicated region fallthrough
CT: control target
= control target key end

     0   :  { %vm19_vm0 = vcmask 261120   ;;  %v63_v1 = vmov 0   ;;  %v31_v7 = vlaneseq  ;;  %vm51_vm2 = vcmask 7168   ;;  %s92_s0 = inlined_call_operand.vmem [shape: f32[8,32], index: 0, kind: input, shape index: {}]   ;;  %s93_s1 = inlined_call_operand.vmem [shape: s32[8,1], index: 1, kind: input, shape index: {}]   ;;  %s94_s2 = inlined_call_operand.vmem [shape: f32[8,1], index: 2, kind: output, shape index: {}]  }
   0x1   :  { %v11_v0 = vld [vmem:[%s92_s0] sm:$0xff]  ;;  %58 = vset.pattern.permute.xlu0 %v63_v1 }
   0x2   :  { %v20_v2 = vsel %vm19_vm0, %v11_v0, -inf  ;;  %v12_v3 = vld [vmem:[%s93_s1] sm:$0xff]  ;;  %v32_v8 = vand.u32 127, %v31_v7 }
   0x3   :  { %21 = vmax.xlane.f32.xlu0 %v20_v2 }
  0x19   :  { %34 = vperm.xlu0 %58, %v12_v3  }
  0x8c   :  { %v22_v4 = vpop.xlane.xlu0 %21 }
  0x8d   :  { %v23_v5 = vsub.f32 %v11_v0, %v22_v4 }
  0x8f   :  { %v24_v6 = vmul.f32 1.442695, %v23_v5  ;;  %v41_v14 = vsel %vm19_vm0, %v23_v5, 0.0 }
  0x91   :  { %59 = vpow2.f32 %v24_v6 }
  0x94   :  { %v35_v9 = vpop.permute.xlu0 %34 }
  0x95   :  { %vm36_vm1 = vcmp.eq.s32.totalorder %v32_v8, %v35_v9 }
  0x96   :  { %v37_v12 = vsel %vm36_vm1, %v23_v5, 0.0 }
  0x97   :  { %v38_v13 = vsel %vm19_vm0, %v37_v12, 0.0 }
  0x9e   :  { %v60_v10 = vpop.eup %59 }
  0x9f   :  { %v26_v11 = vsel %vm19_vm0, %v60_v10, 0.0 }
  0xa0   :  { %27 = vadd.xlane.f32.xlu1 %v26_v11 }
  0xa4   :  { %39 = vadd.xlane.f32.xlu1 %v38_v13 }
  0xa8   :  { %42 = vadd.xlane.f32.xlu1 %v41_v14 }
 0x129   :  { %v28_v15 = vpop.xlane.xlu1 %27 }
 0x12a   :  { %61 = vlog2.f32 %v28_v15 }
 0x12d   :  { %v40_v16 = vpop.xlane.xlu1 %39 }
 0x131   :  { %v43_v21 = vpop.xlane.xlu1 %42 }
 0x137   :  { %v62_v17 = vpop.eup %61 }
 0x138   :  { %v30_v18 = vmul.f32 0.6931472, %v62_v17 }
 0x13a   :  { %v44_v19 = vsub.f32 %v40_v16, %v30_v18  ;;  %v46_v20 = vmul.f32 32.0, %v30_v18 }
 0x13c   :  { %v47_v22 = vsub.f32 %v43_v21, %v46_v20  ;;  %v45_v23 = vmul.f32 -0.9, %v44_v19 }
 0x13e   :  { %v48_v24 = vmul.f32 0.003125, %v47_v22 }
 0x140   :  { %v49_v25 = vsub.f32 %v45_v23, %v48_v24 }
 0x142   :  { %52 = vst.msk [vmem:[%s94_s2] sm:$0xff] %vm51_vm2, %v49_v25 }

</bundles_post_ra>
